<compile_context>
chip_gen: v7x
topology: tpu7x:2x2x1
jax: 0.10.0
libtpu: 0.0.40
codegen_flags: <defaults>
</compile_context>

<pallas_src>
import functools

import jax
import jax.numpy as jnp
import numpy as np
from jax.experimental import pallas as pl
from jax.experimental.pallas import tpu as pltpu


def _round_up(x, m):
    return ((x + m - 1) // m) * m


def _pick_tile_s(B, S):
    """Largest convenient seed tile; keep >=2 grid steps for B==1 (v7x 2 TCs)."""
    if S <= 512:
        if B == 1 and S % 256 == 0:
            return S // 2
        return S
    for cand in (512, 384, 256, 128):
        if S % cand == 0:
            return cand
    return S  # fallback: full-extent block is always legal


def _argmax_axis0(x, fill):
    """First-index argmax along axis 0 (torch tie-breaking). (V,T) -> (1,T) i32."""
    m = jnp.max(x, axis=0, keepdims=True)
    row = jax.lax.broadcasted_iota(jnp.int32, x.shape, 0)
    cand = jnp.where(x == m, row, jnp.int32(fill))
    return jnp.min(cand, axis=0, keepdims=True)


def _approach_kernel(*refs, num_view, sample, compute_dtype):
    """One (batch, seed-tile) block per grid step.

    x_ref     : (1, C, tS)   seed features, native torch NCW layout
    w1_ref    : (C, C), b1_ref (C, 1)          conv1 weight / bias
    w2_ref    : (Vp, C), b2_ref (Vp, 1)        conv2 weight / bias (V padded)
    g_ref     : (1, Vp, tS)  1/Exp(1) race noise   (training only)
    res_ref   : (1, C, tS)   relu(conv1(x)), NCW layout (lane-dense store)
    score_ref : (1, tS, Vp)  view_score, torch (B, S, V) layout
    inds_ref  : (1, 1, tS)   int32 sampled (train) / argmax (eval) view index
    """
    if sample:
        (x_ref, w1_ref, b1_ref, w2_ref, b2_ref, g_ref,
         res_ref, score_ref, inds_ref) = refs
    else:
        (x_ref, w1_ref, b1_ref, w2_ref, b2_ref,
         res_ref, score_ref, inds_ref) = refs
        g_ref = None

    x = x_ref[0]                                    # (C, tS)
    w1 = w1_ref[...]                                # (C, C)
    w2 = w2_ref[...]                                # (Vp, C)
    if compute_dtype != jnp.float32:                # bf16 matmul inputs, f32 acc
        x = x.astype(compute_dtype)
        w1 = w1.astype(compute_dtype)
        w2 = w2.astype(compute_dtype)

    # conv1 (1x1) + ReLU: standard MXU matmul; bias / relu in f32 on the VPU.
    res = jnp.dot(w1, x, preferred_element_type=jnp.float32) + b1_ref[...]
    res = jnp.maximum(res, 0.0)                     # (C, tS) f32
    res_ref[0] = res.astype(res_ref.dtype)          # S in lane dim -> unmasked vst

    # conv2 (1x1): standard MXU matmul -> (Vp, tS); no transposed operands.
    res_c = res if compute_dtype == jnp.float32 else res.astype(compute_dtype)
    s = jnp.dot(w2, res_c, preferred_element_type=jnp.float32) + b2_ref[...]

    # torch layout (S, V): one in-kernel XLU transpose; Vp multiple of 128 (or
    # the full extent) -> lane-dense score store.
    score_ref[0] = jnp.transpose(s).astype(score_ref.dtype)

    v_pad = s.shape[0]
    padded = v_pad != num_view
    if padded:
        row = jax.lax.broadcasted_iota(jnp.int32, s.shape, 0)
        valid = row < num_view

    if sample:
        # torch: multinomial((s - min) / (max - min + 1e-8), 1).
        # Exponential race: argmax_v(w_v * g_v), g = 1/Exp(1) picks v with
        # probability w_v / sum(w).  Any positive per-row rescale of w (the
        # max-min+eps denominator) leaves that distribution unchanged, so the
        # weights are simply (s - s_min): no division, no transcendental.
        s_for_min = jnp.where(valid, s, jnp.float32(3.0e38)) if padded else s
        s_min = jnp.min(s_for_min, axis=0, keepdims=True)     # (1, tS)
        r = (s - s_min) * g_ref[0]                            # (Vp, tS), >=0 valid
        if padded:
            r = jnp.where(valid, r, jnp.float32(-1.0))        # pads never win
        target = r
    else:
        # Eval path: plain argmax over the raw view scores.
        target = jnp.where(valid, s, jnp.float32(-3.0e38)) if padded else s

    inds_ref[0] = _argmax_axis0(target, v_pad)                # (1, tS) lane-dense


def approach_net_pallas(seed_features, w1, b1, w2, b2, *, is_training=True,
                        rng_key=None, compute_dtype=jnp.float32, tile_s=None):
    """seed_features: (B, C, S) float32 (torch NCW layout).

    Returns (res_features (B,C,S) f32, view_score (B,S,V) f32,
             top_view_inds (B,S) int32).
    """
    B, C, S = seed_features.shape
    V = w2.shape[0]

    # Pad the view axis to a multiple of 128 when V >= 128 (e.g. 300 -> 384).
    v_pad = V if (V < 128 or V % 128 == 0) else _round_up(V, 128)

    if tile_s is None:
        tile_s = _pick_tile_s(B, S)
    assert S % tile_s == 0, "num_seed must be divisible by tile_s"
    n_s_tiles = S // tile_s

    w1 = jnp.asarray(w1, jnp.float32)
    b1_col = jnp.reshape(jnp.asarray(b1, jnp.float32), (C, 1))
    w2 = jnp.asarray(w2, jnp.float32)
    b2 = jnp.asarray(b2, jnp.float32)
    if v_pad != V:
        w2 = jnp.zeros((v_pad, C), jnp.float32).at[:V].set(w2)
        b2 = jnp.zeros((v_pad,), jnp.float32).at[:V].set(b2)
    b2_col = jnp.reshape(b2, (v_pad, 1))

    kernel = functools.partial(_approach_kernel, num_view=V,
                               sample=bool(is_training),
                               compute_dtype=compute_dtype)

    in_specs = [
        pl.BlockSpec((1, C, tile_s), lambda b, s: (b, 0, s)),       # x (NCW)
        pl.BlockSpec((C, C), lambda b, s: (0, 0)),                  # w1 (resident)
        pl.BlockSpec((C, 1), lambda b, s: (0, 0)),                  # b1
        pl.BlockSpec((v_pad, C), lambda b, s: (0, 0)),              # w2 (padded)
        pl.BlockSpec((v_pad, 1), lambda b, s: (0, 0)),              # b2 (padded)
    ]
    args = [seed_features, w1, b1_col, w2, b2_col]

    if is_training:
        if rng_key is None:
            rng_key = jax.random.PRNGKey(0)
        # One Exp(1) variate per (batch, view, seed); passed as g = 1/E so the
        # kernel only multiplies and argmaxes (no logs / divides in-kernel).
        e = jax.random.exponential(rng_key, (B, v_pad, S), dtype=jnp.float32)
        g = 1.0 / jnp.maximum(e, jnp.float32(1e-20))
        in_specs.append(pl.BlockSpec((1, v_pad, tile_s), lambda b, s: (b, 0, s)))
        args.append(g)

    out_specs = [
        pl.BlockSpec((1, C, tile_s), lambda b, s: (b, 0, s)),       # res (NCW)
        pl.BlockSpec((1, tile_s, v_pad), lambda b, s: (b, s, 0)),   # view_score
        pl.BlockSpec((1, 1, tile_s), lambda b, s: (b, 0, s)),       # top inds
    ]
    out_shape = (
        jax.ShapeDtypeStruct((B, C, S), jnp.float32),
        jax.ShapeDtypeStruct((B, S, v_pad), jnp.float32),
        jax.ShapeDtypeStruct((B, 1, S), jnp.int32),
    )

    grid_spec = pltpu.PrefetchScalarGridSpec(
        num_scalar_prefetch=0,
        grid=(B, n_s_tiles),
        in_specs=in_specs,
        out_specs=out_specs,
    )

    res_features, view_score, top_view_inds = pl.pallas_call(
        kernel,
        grid_spec=grid_spec,
        out_shape=out_shape,
        compiler_params=pltpu.CompilerParams(
            dimension_semantics=("parallel", "parallel")),
    )(*args)

    if v_pad != V:
        view_score = view_score[..., :V]
    return res_features, view_score, jnp.squeeze(top_view_inds, axis=1)


def approach_net_forward(seed_features, params, seed=0, is_training=True,
                         compute_dtype=jnp.float32):
    """Full forward pass. Returns (end_points dict, res_features)."""
    w1, b1, w2, b2 = params
    res_features, view_score, top_view_inds = approach_net_pallas(
        seed_features, w1, b1, w2, b2,
        is_training=is_training,
        rng_key=jax.random.PRNGKey(seed),
        compute_dtype=compute_dtype)

    end_points = {
        "view_score": view_score,                    # (B, S, V)
        "grasp_top_view_inds": top_view_inds,        # (B, S) int32
    }
    if not is_training:
        # TODO(synk): grasp_top_view_xyz / grasp_top_view_rot require
        # generate_grasp_views / batch_viewpoint_params_to_matrix (not provided).
        pass
    return end_points, res_features


def _reference_forward(seed_features, params):
    """Pure-JAX reference for the deterministic part of the forward pass."""
    w1, b1, w2, b2 = params
    res = jnp.einsum("oc,bcs->bos", w1, seed_features) + b1[None, :, None]
    res = jnp.maximum(res, 0.0)
    feat = jnp.einsum("vc,bcs->bvs", w2, res) + b2[None, :, None]
    view_score = jnp.transpose(feat, (0, 2, 1))
    return res, view_score


if __name__ == "__main__":
    # Small shapes consistent with the module (Conv1d over seed points).
    B, C, S, V = 2, 32, 64, 16   # batch, seed_feature_dim, num_seed, num_view

    key = jax.random.PRNGKey(0)
    k_x, k_w1, k_b1, k_w2, k_b2 = jax.random.split(key, 5)

    seed_features = jax.random.normal(k_x, (B, C, S), dtype=jnp.float32)
    # Conv1d weight shapes (out, in, 1) -> (out, in).
    w1 = 0.1 * jax.random.normal(k_w1, (C, C), dtype=jnp.float32)
    b1 = 0.1 * jax.random.normal(k_b1, (C,), dtype=jnp.float32)
    w2 = 0.1 * jax.random.normal(k_w2, (V, C), dtype=jnp.float32)
    b2 = 0.1 * jax.random.normal(k_b2, (V,), dtype=jnp.float32)
    params = (w1, b1, w2, b2)

    res_ref, vs_ref = _reference_forward(seed_features, params)

    # Training path (multinomial draw via in-kernel exponential race).
    end_points, res_features = approach_net_forward(
        seed_features, params, seed=1234, is_training=True)
    jax.block_until_ready((end_points, res_features))

    np.testing.assert_allclose(np.asarray(res_features), np.asarray(res_ref),
                               rtol=1e-4, atol=1e-4)
    np.testing.assert_allclose(np.asarray(end_points["view_score"]),
                               np.asarray(vs_ref), rtol=1e-4, atol=1e-4)
    inds = np.asarray(end_points["grasp_top_view_inds"])
    assert inds.shape == (B, S) and inds.dtype == np.int32
    assert inds.min() >= 0 and inds.max() < V

    # Eval path: argmax over raw view scores (geometry branch is a TODO).
    end_points_eval, _ = approach_net_forward(
        seed_features, params, seed=0, is_training=False)
    jax.block_until_ready(end_points_eval)
    np.testing.assert_array_equal(
        np.asarray(end_points_eval["grasp_top_view_inds"]),
        np.argmax(np.asarray(end_points_eval["view_score"]), axis=-1))

    # Padded-view-axis path (V >= 128, not a multiple of 128): exercises the
    # pad + mask logic (pad views must never be selected).
    Vp = 130
    kp_w2, kp_b2 = jax.random.split(jax.random.PRNGKey(7), 2)
    w2_p = 0.1 * jax.random.normal(kp_w2, (Vp, C), dtype=jnp.float32)
    b2_p = 0.1 * jax.random.normal(kp_b2, (Vp,), dtype=jnp.float32)
    params_p = (w1, b1, w2_p, b2_p)
    _, vs_ref_p = _reference_forward(seed_features, params_p)

    ep_p, _ = approach_net_forward(seed_features, params_p, seed=5,
                                   is_training=True)
    jax.block_until_ready(ep_p)
    np.testing.assert_allclose(np.asarray(ep_p["view_score"]),
                               np.asarray(vs_ref_p), rtol=1e-4, atol=1e-4)
    inds_p = np.asarray(ep_p["grasp_top_view_inds"])
    assert inds_p.min() >= 0 and inds_p.max() < Vp

    ep_p_eval, _ = approach_net_forward(seed_features, params_p, seed=0,
                                        is_training=False)
    jax.block_until_ready(ep_p_eval)
    np.testing.assert_array_equal(
        np.asarray(ep_p_eval["grasp_top_view_inds"]),
        np.argmax(np.asarray(ep_p_eval["view_score"]), axis=-1))

    # bf16-compute path (f32 accumulation) — looser numeric tolerance.
    ep_bf16, _ = approach_net_forward(seed_features, params, seed=1234,
                                      is_training=True,
                                      compute_dtype=jnp.bfloat16)
    jax.block_until_ready(ep_bf16)
    np.testing.assert_allclose(np.asarray(ep_bf16["view_score"]),
                               np.asarray(vs_ref), rtol=5e-2, atol=5e-2)

    print("KERNEL_OK")
</pallas_src>

<mosaic_0001>
module attributes {stable_mosaic.version = 11 : i64} {
  func.func @_approach_kernel(%arg0: i32, %arg1: i32, %arg2: memref<1x32x64xf32, #tpu.memory_space<vmem>>, %arg3: memref<32x32xf32, #tpu.memory_space<vmem>>, %arg4: memref<32x1xf32, #tpu.memory_space<vmem>>, %arg5: memref<16x32xf32, #tpu.memory_space<vmem>>, %arg6: memref<16x1xf32, #tpu.memory_space<vmem>>, %arg7: memref<1x16x64xf32, #tpu.memory_space<vmem>>, %arg8: memref<1x32x64xf32, #tpu.memory_space<vmem>>, %arg9: memref<1x64x16xf32, #tpu.memory_space<vmem>>, %arg10: memref<1x1x64xi32, #tpu.memory_space<vmem>>) attributes {dimension_semantics = [#tpu.dimension_semantics<parallel>, #tpu.dimension_semantics<parallel>], iteration_bounds = array<i64: 2, 1>, scalar_prefetch = 0 : i64, scratch_operands = 0 : i64, tpu.core_type = #tpu.core_type<tc>, window_params = [{transform_indices = @transform_0, window_bounds = array<i64: 1, 32, 64>}, {pipeline_mode = #tpu.pipeline_mode<synchronous>, transform_indices = @transform_1, window_bounds = array<i64: 32, 32>}, {pipeline_mode = #tpu.pipeline_mode<synchronous>, transform_indices = @transform_2, window_bounds = array<i64: 32, 1>}, {pipeline_mode = #tpu.pipeline_mode<synchronous>, transform_indices = @transform_3, window_bounds = array<i64: 16, 32>}, {pipeline_mode = #tpu.pipeline_mode<synchronous>, transform_indices = @transform_4, window_bounds = array<i64: 16, 1>}, {transform_indices = @transform_5, window_bounds = array<i64: 1, 16, 64>}, {transform_indices = @transform_6, window_bounds = array<i64: 1, 32, 64>}, {transform_indices = @transform_7, window_bounds = array<i64: 1, 64, 16>}, {transform_indices = @transform_8, window_bounds = array<i64: 1, 1, 64>}]} {
    %c0 = arith.constant 0 : index
    %c0_0 = arith.constant 0 : index
    %c0_1 = arith.constant 0 : index
    %0 = vector.load %arg2[%c0, %c0_0, %c0_1] : memref<1x32x64xf32, #tpu.memory_space<vmem>>, vector<1x32x64xf32>
    %1 = vector.shape_cast %0 : vector<1x32x64xf32> to vector<32x64xf32>
    %c0_2 = arith.constant 0 : index
    %c0_3 = arith.constant 0 : index
    %2 = vector.load %arg3[%c0_2, %c0_3] : memref<32x32xf32, #tpu.memory_space<vmem>>, vector<32x32xf32>
    %c0_4 = arith.constant 0 : index
    %c0_5 = arith.constant 0 : index
    %3 = vector.load %arg5[%c0_4, %c0_5] : memref<16x32xf32, #tpu.memory_space<vmem>>, vector<16x32xf32>
    %cst = arith.constant dense<0.000000e+00> : vector<32x64xf32>
    %4 = tpu.matmul %2, %1, %cst {dimension_numbers = #tpu.dot_dimension_numbers<[1], [0], [0], [1], [0, 0, 1, 1], [], []>} : vector<32x32xf32>, vector<32x64xf32>, vector<32x64xf32> -> vector<32x64xf32>
    %c0_6 = arith.constant 0 : index
    %c0_7 = arith.constant 0 : index
    %5 = vector.load %arg4[%c0_6, %c0_7] : memref<32x1xf32, #tpu.memory_space<vmem>>, vector<32x1xf32>
    %6 = vector.broadcast %5 : vector<32x1xf32> to vector<32x64xf32>
    %7 = arith.addf %4, %6 : vector<32x64xf32>
    %cst_8 = arith.constant 0.000000e+00 : f32
    %8 = vector.broadcast %cst_8 : f32 to vector<32x64xf32>
    %9 = arith.maximumf %7, %8 : vector<32x64xf32>
    %c0_9 = arith.constant 0 : index
    %c0_10 = arith.constant 0 : index
    %c0_11 = arith.constant 0 : index
    %10 = vector.load %arg8[%c0_9, %c0_10, %c0_11] : memref<1x32x64xf32, #tpu.memory_space<vmem>>, vector<1x32x64xf32>
    %11 = vector.shape_cast %10 : vector<1x32x64xf32> to vector<32x64xf32>
    %12 = vector.shape_cast %9 : vector<32x64xf32> to vector<1x32x64xf32>
    tpu.vector_store %arg8[%c0_9, %c0_10, %c0_11], %12 {strides = array<i32>} : memref<1x32x64xf32, #tpu.memory_space<vmem>>, vector<1x32x64xf32>,
    %cst_12 = arith.constant dense<0.000000e+00> : vector<16x64xf32>
    %13 = tpu.matmul %3, %9, %cst_12 {dimension_numbers = #tpu.dot_dimension_numbers<[1], [0], [0], [1], [0, 0, 1, 1], [], []>} : vector<16x32xf32>, vector<32x64xf32>, vector<16x64xf32> -> vector<16x64xf32>
    %c0_13 = arith.constant 0 : index
    %c0_14 = arith.constant 0 : index
    %14 = vector.load %arg6[%c0_13, %c0_14] : memref<16x1xf32, #tpu.memory_space<vmem>>, vector<16x1xf32>
    %15 = vector.broadcast %14 : vector<16x1xf32> to vector<16x64xf32>
    %16 = arith.addf %13, %15 : vector<16x64xf32>
    %17 = tpu.transpose %16, [1, 0] : vector<16x64xf32> -> vector<64x16xf32>
    %c0_15 = arith.constant 0 : index
    %c0_16 = arith.constant 0 : index
    %c0_17 = arith.constant 0 : index
    %18 = vector.load %arg9[%c0_15, %c0_16, %c0_17] : memref<1x64x16xf32, #tpu.memory_space<vmem>>, vector<1x64x16xf32>
    %19 = vector.shape_cast %18 : vector<1x64x16xf32> to vector<64x16xf32>
    %20 = vector.shape_cast %17 : vector<64x16xf32> to vector<1x64x16xf32>
    tpu.vector_store %arg9[%c0_15, %c0_16, %c0_17], %20 {strides = array<i32>} : memref<1x64x16xf32, #tpu.memory_space<vmem>>, vector<1x64x16xf32>,
    %cst_18 = arith.constant dense<0x7F800000> : vector<64xf32>
    %21 = vector.multi_reduction <minimumf>, %16, %cst_18 [0] : vector<16x64xf32> to vector<64xf32>
    %22 = vector.shape_cast %21 : vector<64xf32> to vector<1x64xf32>
    %23 = vector.broadcast %22 : vector<1x64xf32> to vector<16x64xf32>
    %24 = arith.subf %16, %23 : vector<16x64xf32>
    %c0_19 = arith.constant 0 : index
    %c0_20 = arith.constant 0 : index
    %c0_21 = arith.constant 0 : index
    %25 = vector.load %arg7[%c0_19, %c0_20, %c0_21] : memref<1x16x64xf32, #tpu.memory_space<vmem>>, vector<1x16x64xf32>
    %26 = vector.shape_cast %25 : vector<1x16x64xf32> to vector<16x64xf32>
    %27 = arith.mulf %24, %26 : vector<16x64xf32>
    %cst_22 = arith.constant dense<0xFF800000> : vector<64xf32>
    %28 = vector.multi_reduction <maximumf>, %27, %cst_22 [0] : vector<16x64xf32> to vector<64xf32>
    %29 = vector.shape_cast %28 : vector<64xf32> to vector<1x64xf32>
    %30 = tpu.iota {dimensions = array<i32: 0>} : vector<16x64xi32>
    %31 = vector.broadcast %29 : vector<1x64xf32> to vector<16x64xf32>
    %32 = arith.cmpf oeq, %27, %31 : vector<16x64xf32>
    %c16_i32 = arith.constant 16 : i32
    %33 = vector.broadcast %c16_i32 : i32 to vector<16x64xi32>
    %34 = arith.select %32, %30, %33 : vector<16x64xi1>, vector<16x64xi32>
    %cst_23 = arith.constant dense<2147483647> : vector<64xi32>
    %35 = vector.multi_reduction <minsi>, %34, %cst_23 [0] : vector<16x64xi32> to vector<64xi32>
    %36 = vector.shape_cast %35 : vector<64xi32> to vector<1x64xi32>
    %c0_24 = arith.constant 0 : index
    %c0_25 = arith.constant 0 : index
    %c0_26 = arith.constant 0 : index
    %37 = vector.load %arg10[%c0_24, %c0_25, %c0_26] : memref<1x1x64xi32, #tpu.memory_space<vmem>>, vector<1x1x64xi32>
    %38 = vector.shape_cast %37 : vector<1x1x64xi32> to vector<1x64xi32>
    %39 = vector.shape_cast %36 : vector<1x64xi32> to vector<1x1x64xi32>
    tpu.vector_store %arg10[%c0_24, %c0_25, %c0_26], %39 {strides = array<i32>} : memref<1x1x64xi32, #tpu.memory_space<vmem>>, vector<1x1x64xi32>,
    return
  }
  func.func @transform_0(%arg0: i32, %arg1: i32) -> (i32, i32, i32) {
    %c0_i32 = arith.constant 0 : i32
    %c0_i32_0 = arith.constant 0 : i32
    return %arg0, %c0_i32, %arg1 : i32, i32, i32
  }
  func.func @transform_1(%arg0: i32, %arg1: i32) -> (i32, i32) {
    %c0_i32 = arith.constant 0 : i32
    %c0_i32_0 = arith.constant 0 : i32
    %c0_i32_1 = arith.constant 0 : i32
    return %c0_i32, %c0_i32_0 : i32, i32
  }
  func.func @transform_2(%arg0: i32, %arg1: i32) -> (i32, i32) {
    %c0_i32 = arith.constant 0 : i32
    %c0_i32_0 = arith.constant 0 : i32
    %c0_i32_1 = arith.constant 0 : i32
    return %c0_i32, %c0_i32_0 : i32, i32
  }
  func.func @transform_3(%arg0: i32, %arg1: i32) -> (i32, i32) {
    %c0_i32 = arith.constant 0 : i32
    %c0_i32_0 = arith.constant 0 : i32
    %c0_i32_1 = arith.constant 0 : i32
    return %c0_i32, %c0_i32_0 : i32, i32
  }
  func.func @transform_4(%arg0: i32, %arg1: i32) -> (i32, i32) {
    %c0_i32 = arith.constant 0 : i32
    %c0_i32_0 = arith.constant 0 : i32
    %c0_i32_1 = arith.constant 0 : i32
    return %c0_i32, %c0_i32_0 : i32, i32
  }
  func.func @transform_5(%arg0: i32, %arg1: i32) -> (i32, i32, i32) {
    %c0_i32 = arith.constant 0 : i32
    %c0_i32_0 = arith.constant 0 : i32
    return %arg0, %c0_i32, %arg1 : i32, i32, i32
  }
  func.func @transform_6(%arg0: i32, %arg1: i32) -> (i32, i32, i32) {
    %c0_i32 = arith.constant 0 : i32
    %c0_i32_0 = arith.constant 0 : i32
    return %arg0, %c0_i32, %arg1 : i32, i32, i32
  }
  func.func @transform_7(%arg0: i32, %arg1: i32) -> (i32, i32, i32) {
    %c0_i32 = arith.constant 0 : i32
    %c0_i32_0 = arith.constant 0 : i32
    return %arg0, %arg1, %c0_i32 : i32, i32, i32
  }
  func.func @transform_8(%arg0: i32, %arg1: i32) -> (i32, i32, i32) {
    %c0_i32 = arith.constant 0 : i32
    %c0_i32_0 = arith.constant 0 : i32
    return %arg0, %c0_i32, %arg1 : i32, i32, i32
  }
}

</mosaic_0001>

<bundles_post_ra>
// kernel: tpu_custom_call.1
= control target key start
LH: loop header
LB: loop body
LE: loop exit
PB: predicated region body
PF: predicated region fallthrough
CT: control target
= control target key end

     0   :  { %s1706_s0 = inlined_call_operand.hbm [shape: f32[2,32,64], index: 0, kind: input, shape index: {}]   ;;  %s1707_s1 = inlined_call_operand.vmem [shape: f32[32,32], index: 1, kind: input, shape index: {}]   ;;  %s1708_s2 = inlined_call_operand.vmem [shape: f32[32,1], index: 2, kind: input, shape index: {}]   ;;  %s1709_s3 = inlined_call_operand.hbm [shape: f32[16,32], index: 3, kind: input, shape index: {}]   ;;  %s1710_s4 = inlined_call_operand.vmem [shape: f32[16,1], index: 4, kind: input, shape index: {}]   ;;  %s1711_s5 = inlined_call_operand.vmem [shape: f32[2,16,64], index: 5, kind: input, shape index: {}]   ;;  %s1712_s6 = inlined_call_operand.hbm [shape: f32[2,32,64], index: 6, kind: output, shape index: {0}]   ;;  %s1713_s7 = inlined_call_operand.vmem [shape: f32[2,64,16], index: 7, kind: output, shape index: {1}]   ;;  %s1714_s8 = inlined_call_operand.hbm [shape: s32[2,1,64], index: 8, kind: output, shape index: {2}]  }
   0x1   :  { %1722 = sst [smem:[#allocation15_spill]] %s1709_s3 }
   0x2   :  { %14 = vsyncpa [#allocation3], 0 }
   0x3   :  { %16 = vsyncpa [#allocation3 + $0x1], 0 }
   0x4   :  { %17 = vsyncpa [#allocation6], 0 }
   0x5   :  { %18 = vsyncpa [#allocation4], 0 }
   0x6   :  { %20 = vsyncpa [#allocation4 + $0x1], 0 }
   0x7   :  { %21 = vsyncpa [#allocation9], 0 }
   0x8   :  { %23 = vsyncpa [#allocation9 + $0x1], 0  ;;  %s1373_s27 = smov 0   ;;  %s1375_s28 = smov 0  }
   0x9   :  { %s1377_s29 = smov 0   ;;  %s1379_s30 = smov 0  }
   0xa   :  { %s1381_s9 = smov 0   ;;  %s1383_s10 = smov 0  }
   0xb LB: > { %s968_s11 = sadd.s32 4294967295, %s1317_s10   ;;  %s969_s12 = sadd.s32 4294967294, %s1317_s10   ;;  %s1317_s10 = sphi %s1383_s10, %s29_s10   ;;  %s1313_s9 = sphi %s1381_s9, %s1747_s9   ;;  %s1309_s30 = sphi %s1379_s30, %s1746_s30   ;;  %s1305_s29 = sphi %s1377_s29, %s1745_s29   ;;  %s1301_s28 = sphi %s1375_s28, %s1744_s28   ;;  %s1297_s27 = sphi %s1373_s27, %s1743_s27  }
   0xc   : > { %p63_p0 = scmp.ne.s32.totalorder %s1301_s28, %s1297_s27  ;;  %p1407_p1 = scmp.eq.s32.totalorder %s968_s11, 0 }
   0xd   : > { %p1411_p2 = scmp.eq.s32.totalorder %s968_s11, 1  ;;  %p207_p3 = scmp.eq.s32.totalorder %s969_s12, 1 }
   0xe   : > { %s1723_s13 = scalar_select %p1407_p1, 1, 0 }
   0xf   : > { %s1724_s14 = scalar_select %p1411_p2, 1, 0 }
  0x10   : > { %p1417_p4 = por %p1407_p1, %p63_p0  ;;  %p970_p5 = scmp.ge.s32.totalorder %s1317_s10, 1 }
  0x11   : > { %p1422_p6 = por %p207_p3, %p63_p0  ;;  %p270_p7 = scmp.lt.s32.totalorder %s1317_s10, 3 }
  0x12   : > { %s1725_s15 = scalar_select %p1417_p4, 1, 0 }
  0x13   : > { %s1726_s16 = scalar_select %p1422_p6, 1, 0 }
  0x14   : > { %p1427_p8 = pnand %p970_p5, %p270_p7  ;;  %s1319_s18 = smov [#allocation5]  }
  0x15   : > { %1727 = sst [smem:[#allocation14_spill]] %s1726_s16  ;;  %s288_s19 = sshll.u32 %s1319_s18, 4  ;;  %s289_s19 = int_to_ptr.vmem [resolvable:$true] %s288_s19 }
  0x16   : > { %s1728_s17 = scalar_select %p1427_p8, 1, 0 }
  0x17   : > { %p1065_p9 = pneg %p1427_p8  ;;  %s41_s21 = sadd.s32 1, %s1313_s9 }
  0x18   : > { %s1730_s3 = sld [smem:[#allocation15_spill]] }
  0x19   : > { %p1436_p11 = pnand %p1065_p9, %p1407_p1 }
  0x1b   : > { %p1143_p13 = pneg %p1436_p11 }
  0x1e   : > { %s1141_s24 = scalar_lea.hbm %s1730_s3, 256 }
  0x1f   : > { %p1142_p12 = scmp.ne.s32.totalorder %s1730_s3, %s1141_s24  ;;  %p1148_p5 = scmp.lt.u32.totalorder %s1141_s24, %s1730_s3 }
  0x21   : > { %p1144_p0 = pnand %p1143_p13, %p1142_p12 }
  0x23   : > { %p1145_p3 = pneg %p1144_p0 }
  0x25   : > { %p1150_p7 = pnand %p1148_p5, %p1145_p3 }
  0x27   : > { %1153 = shalt.err (!%p1150_p7)
}
  0x28   : > { %s1154_s18 = scalar_lea.vmem %s289_s19, 256  ;;  %p1162_p1 = scmp.lt.s32.totalorder %s289_s19, %s289_s19 }
  0x29   : > { %p1155_p9 = scmp.ne.s32.totalorder %s289_s19, %s1154_s18  ;;  %p1163_p4 = scmp.lt.s32.totalorder %s1154_s18, %s1154_s18 }
  0x2b   : > { %p1157_p10 = pnand %p1155_p9, %p1143_p13  ;;  %p1164_p8 = por %p1163_p4, %p1162_p1 }
  0x2d   : > { %p1158_p6 = pneg %p1157_p10 }
  0x2f   : > { %p1165_p2 = pnand %p1164_p8, %p1158_p6 }
  0x31   : > { %1168 = shalt.err (!%p1165_p2)
}
  0x32   : > { %s1719_s22 = smov 128   ;;  %s1720_s23 = smov 8  }
  0x33   : > { %1068 = dma.hbm_to_vmem [thread:$0]  (!%p1436_p11), %s1730_s3, 256, %s289_s19, [#allocation6], %s1719_s22, %s1719_s22, %s1720_s23  }
  0x34   : > { %p43_p1 = scmp.ge.s32.totalorder %s41_s21, 2  ;;  %s50_s26 = sadd.s32 1, %s1305_s29 }
  0x35   : > { %p57_p2 = scmp.ne.s32.totalorder %s1305_s29, %s1301_s28  ;;  %p58_p4 = scmp.eq.s32.totalorder %s1317_s10, 0 }
  0x36   : > { %s1749_s21 = smov (%p43_p1, %s41_s21), 0  ;;  %p1732_p8 = scmp.ne.s32.totalorder %s1724_s14, 0 }
  0x37   : > { %p1466_p6 = por %p58_p4, %p57_p2  ;;  %s45_s12 = ssub.s32 %s1313_s9, %s1749_s21 }
  0x38   : > { %p1472_p10 = por %p1732_p8, %p57_p2  ;;  %p1081_p12 = scmp.lt.s32.totalorder %s1317_s10, 2 }
  0x39   : > { %p48_p11 = scmp.eq.s32.totalorder %s45_s12, 0  ;;  %s305_s19 = sand.u32 1, %s1305_s29  }
  0x3a   : > { %s973_s18 = sshll.u32 %s305_s19, 5  ;;  %s996_s25 = sshll.u32 %s1313_s9, 9 }
  0x3b   : > { %s1481_s24 = scalar_select %p48_p11, %s1305_s29, %s50_s26  }
  0x3c   : > { %s1487_s3 = scalar_lea.hbm %s1706_s0, %s996_s25  ;;  %s309_s14 = scalar_lea.vmem [#allocation2], %s973_s18 }
  0x3d   : > { %s317_s16 = sshll.u32 %s309_s14, 4  ;;  %p1493_p13 = pnand %p1081_p12, %p1466_p6  ;;  %s1489_s16 = int_to_ptr.vmem [resolvable:$true] %s317_s16 }
  0x3e   : > { %s1497_s26 = scalar_lea.sflag [#allocation3], %s305_s19  ;;  %s1169_s22 = scalar_lea.hbm %s1487_s3, 512 }
  0x3f   : > { %p1170_p0 = scmp.ne.s32.totalorder %s1487_s3, %s1169_s22  ;;  %p1171_p3 = pneg %p1493_p13 }
  0x40   : > { %s1174_s11 = scalar_lea.hbm %s1706_s0, 1024  ;;  %p1175_p9 = scmp.lt.u32.totalorder %s1487_s3, %s1706_s0 }
  0x41   : > { %p1172_p5 = pnand %p1171_p3, %p1170_p0  ;;  %p1176_p1 = scmp.lt.u32.totalorder %s1174_s11, %s1169_s22 }
  0x42   : > { %p1178_p4 = scmp.lt.u32.totalorder %s1169_s22, %s1487_s3 }
  0x43   : > { %p1173_p7 = pneg %p1172_p5  ;;  %p1177_p2 = por %p1176_p1, %p1175_p9 }
  0x45   : > { %p1179_p6 = por %p1178_p4, %p1177_p2 }
  0x47   : > { %p1180_p8 = pnand %p1179_p6, %p1173_p7 }
  0x49   : > { %1183 = shalt.err (!%p1180_p8)
}
  0x4a   : > { %s1184_s19 = scalar_lea.vmem %s1489_s16, 512  ;;  %s1322_s23 = smov [#allocation2]  }
  0x4b   : > { %p1185_p12 = scmp.ne.s32.totalorder %s1489_s16, %s1184_s19  ;;  %s1189_s18 = sshll.u32 %s1322_s23, 4  ;;  %s1190_s18 = int_to_ptr.vmem [resolvable:$false] %s1189_s18 }
  0x4c   : > { %s1191_s25 = scalar_lea.vmem %s1190_s18, 1024  ;;  %p1192_p5 = scmp.lt.s32.totalorder %s1489_s16, %s1190_s18 }
  0x4d   : > { %p1187_p11 = pnand %p1185_p12, %p1171_p3  ;;  %p1193_p9 = scmp.lt.s32.totalorder %s1191_s25, %s1184_s19 }
  0x4f   : > { %p1188_p0 = pneg %p1187_p11  ;;  %p1194_p1 = por %p1193_p9, %p1192_p5 }
  0x51   : > { %p1195_p2 = pnand %p1194_p1, %p1188_p0 }
  0x53   : > { %1198 = shalt.err (!%p1195_p2)
}
  0x54   : > { %s1735_s22 = smov 8   ;;  %s1736_s11 = smov 128  }
  0x55   : > { %1072 = dma.hbm_to_vmem [thread:$0]  (!%p1493_p13), %s1487_s3, 512, %s1489_s16, %s1497_s26, %s1736_s11, %s1736_s11, %s1735_s22  }
  0x56   : > { %p1737_p3 = scmp.ne.s32.totalorder %s1728_s17, 0 }
  0x57   : > { %s1531_s14 = sand.u32 (!%p1737_p3), 1, %s1301_s28   ;;  %p1738_p7 = scmp.ne.s32.totalorder (!%p1737_p3), %s1725_s15, 0 }
  0x58   : > { %340 = sbr.rel (%p1737_p3) target bundleno = 710 (0x2c6), region = 44  ;;  %s977_s19 = sshll.u32 (!%p1737_p3), %s1531_s14, 5 }
  0x59   : > { %s343_s23 = scalar_lea.sflag (!%p1737_p3), [#allocation3], %s1531_s14  ;;  %s346_s12 = scalar_lea.vmem (!%p1737_p3), [#allocation2], %s977_s19 }
  0x5f   : > { %1280 = dma.done.wait (%p1738_p7), %s343_s23, 512  }
  0x60   : > { %1282 = vsyncadd (%p1738_p7), %s343_s23, 4294966784  ;;  %p1739_p13 = scmp.ne.s32.totalorder %s1723_s13, 0 }
  0x62   : > { %1284 = dma.done.wait (%p1739_p13), [#allocation6], 256  }
  0x63   : > { %1286 = vsyncadd (%p1739_p13), [#allocation6], 4294967040  ;;  %v1323_v0 = vmov 0   ;;  %vm456_vm0 = vcmask 261120   ;;  %v422_v1 = vld [vmem:[%s346_s12] sm:$0xff]  ;;  %v423_v2 = vld [vmem:[%s346_s12 + $0x8] sm:$0xff]  ;;  %v721_v62 = vlaneseq }
  0x64   : > { %1139 = vset.pattern.permute.xlu0 %v1323_v0  ;;  %1140 = vset.pattern.permute.xlu1 %v1323_v0  ;;  %v424_v3 = vld [vmem:[%s346_s12 + $0x10] sm:$0xff]  ;;  %v1039_v4 = vpack.c.bf16 %v423_v2, %v422_v1  ;;  %v425_v5 = vld [vmem:[%s346_s12 + $0x18] sm:$0xff]  ;;  %v426_v6 = vld [vmem:[%s1707_s1] sm:$0xff]  ;;  %vm558_vm1 = vcmask 523264   ;;  %s1582_s22 = scalar_lea.vmem [#allocation7], %s977_s19  ;;  %p404_p4 = scmp.lt.s32.totalorder %s1309_s30, 1 }
  0x65   : > { %v1043_v7 = vpack.c.bf16 %v425_v5, %v424_v3  ;;  %1022 = vmatprep.mubr.msk.f32.mxu0 %vm456_vm0, %v426_v6  ;;  %v432_v8 = vld [vmem:[%s1708_s2] sm:$0xff]  ;;  %v434_v9 = vld [vmem:[%s1708_s2 + $0x10] sm:$0xff]  ;;  %v433_v10 = vld [vmem:[%s1708_s2 + $0x8] sm:$0xff]  ;;  %s771_s16 = sshll.u32 %s1582_s22, 4  ;;  %v722_v1 = vshrl.u32 %v721_v62, 7  ;;  %s999_s15 = sshll.u32 %s1309_s30, 9  ;;  %s1606_s16 = int_to_ptr.vmem [resolvable:$true] %s771_s16 }
  0x66   : > { %1040 = vmatprep.subr.bf16.mxu0 %v1039_v4  ;;  %438 = vperm.xlu0 %1139, %v432_v8   ;;  %v435_v11 = vld [vmem:[%s1708_s2 + $0x18] sm:$0xff]  ;;  %v427_v12 = vld [vmem:[%s1707_s1 + $0x8] sm:$0xff]  ;;  %v563_v13 = vld [vmem:[%s1710_s4] sm:$0xff]  ;;  %s1597_s19 = scalar_select %p404_p4, %s1309_s30, 1 }
  0x67   : > { %1042 = vmatpush3.bf16.msra.mxu0 %v1039_v4  ;;  %448 = vperm.xlu1 %1140, %v434_v9   ;;  %v428_v14 = vld [vmem:[%s1707_s1 + $0x10] sm:$0xff]  ;;  %v564_v15 = vld [vmem:[%s1710_s4 + $0x8] sm:$0xff]  ;;  %v429_v16 = vld [vmem:[%s1707_s1 + $0x18] sm:$0xff]  ;;  %s1612_s26 = scalar_lea.hbm %s1712_s6, %s999_s15  ;;  %s744_s18 = scalar_lea.sflag [#allocation4], %s1531_s14 }
  0x68   : > { %1044 = vmatprep.subr.bf16.mxu0 %v1043_v7  ;;  %v430_v17 = vld [vmem:[#allocation5] sm:$0xff]  ;;  %v431_v36 = vld [vmem:[#allocation5 + $0x8] sm:$0xff]  ;;  %s997_s11 = sshll.u32 %s1597_s19, 4  ;;  %s1199_s25 = scalar_lea.vmem %s1606_s16, 512 }
  0x69   : > { %1036 = vmatprep.mubr.msk.f32.mxu1 %vm456_vm0, %v430_v17  ;;  %s411_s3 = scalar_lea.vmem %s1711_s5, %s997_s11  ;;  %p1200_p6 = scmp.ne.s32.totalorder %s1606_s16, %s1199_s25 }
  0x6a   : > { %443 = vperm.xlu0 %1139, %v433_v10   ;;  %v708_v52 = vld [vmem:[%s411_s3] sm:$0xff]  ;;  %v709_v53 = vld [vmem:[%s411_s3 + $0x8] sm:$0xff] }
  0x6b   : > { %1046 = vmatpush3.bf16.msra.mxu0 %v1043_v7  ;;  %453 = vperm.xlu1 %1140, %v435_v11   ;;  %p1201_p8 = pnand %p1200_p6, %p1472_p10 }
  0x6d   : > { %p1202_p12 = pneg %p1201_p8 }
  0x6e   : > { %1023 = vmatmul.mubr.msk.f32.vlgmr.msra.gmra.mrb[0].mxu0 %vm456_vm0, %v427_v12  ;;  %567 = vperm.xlu0 %1139, %v563_v13  }
  0x6f   : > { %1025 = vmatprep.mubr.msk.f32.mxu0 %vm456_vm0, %v428_v14  ;;  %572 = vperm.xlu1 %1140, %v564_v15  }
  0x72   : > { %1026 = vmatmul.mubr.msk.f32.gmra.mrb[2].mxu0 %vm456_vm0, %v429_v16 }
  0xe5   : > { %v439_v18 = vpop.permute.xlu0 %438 }
  0xe6   : > { %v449_v19 = vpop.permute.xlu1 %448 }
  0xe9   : > { %v444_v20 = vpop.permute.xlu0 %443 }
  0xea   : > { %v454_v26 = vpop.permute.xlu1 %453 }
  0xed   : > { %v568_v39 = vpop.permute.xlu0 %567 }
  0xee   : > { %v573_v37 = vpop.permute.xlu1 %572 }
 0x141   : > { %v1024_v21 = vpop.f32.mrb[0].mxu0 }
 0x142   : > { %v541_v22 = vadd.f32 %v1024_v21, %v444_v20  ;;  %v535_v23 = vpop.f32.mrb[1].mxu0 }
 0x143   : > { %v536_v24 = vadd.f32 %v535_v23, %v439_v18 }
 0x144   : > { %v555_v25 = vmax.f32 %v541_v22, 0.0 }
 0x145   : > { %v554_v27 = vmax.f32 %v536_v24, 0.0  ;;  %v1027_v28 = vpop.f32.mrb[2].mxu0 }
 0x146   : > { %560 = vst.msk [vmem:[%s1582_s22 + $0x8] sm:$0xff] %vm558_vm1, %v555_v25  ;;  %v551_v29 = vadd.f32 %v1027_v28, %v454_v26  ;;  %v545_v30 = vpop.f32.mrb[3].mxu0 }
 0x147   : > { %559 = vst.msk [vmem:[%s1582_s22] sm:$0xff] %vm558_vm1, %v554_v27  ;;  %v546_v31 = vadd.f32 %v545_v30, %v449_v19  ;;  %v1047_v32 = vpack.c.bf16 %v555_v25, %v554_v27 }
 0x148   : > { %v557_v33 = vmax.f32 %v551_v29, 0.0 }
 0x149   : > { %v556_v34 = vmax.f32 %v546_v31, 0.0  ;;  %1048 = vmatprep.subr.bf16.mxu1 %v1047_v32 }
 0x14a   : > { %562 = vst.msk [vmem:[%s1582_s22 + $0x18] sm:$0xff] %vm558_vm1, %v557_v33  ;;  %1050 = vmatpush3.bf16.msra.mxu1 %v1047_v32 }
 0x14b   : > { %561 = vst.msk [vmem:[%s1582_s22 + $0x10] sm:$0xff] %vm558_vm1, %v556_v34  ;;  %v1051_v35 = vpack.c.bf16 %v557_v33, %v556_v34  ;;  %s1324_s22 = smov [#allocation7]  }
 0x14c   : > { %s1203_s11 = sshll.u32 %s1324_s22, 4  ;;  %s1204_s11 = int_to_ptr.vmem [resolvable:$false] %s1203_s11 }
 0x14d   : > { %1052 = vmatprep.subr.bf16.mxu1 %v1051_v35  ;;  %s1205_s23 = scalar_lea.vmem %s1204_s11, 1024  ;;  %p1206_p11 = scmp.lt.s32.totalorder %s1606_s16, %s1204_s11 }
 0x14e   : > { %1054 = vmatpush3.bf16.msra.mxu1 %v1051_v35  ;;  %p1207_p0 = scmp.lt.s32.totalorder %s1205_s23, %s1199_s25 }
 0x150   : > { %p1208_p5 = por %p1207_p0, %p1206_p11 }
 0x151   : > { %1037 = vmatmul.mubr.msk.f32.vlgmr.msra.gmra.mrb[0].mxu1 %vm456_vm0, %v431_v36 }
 0x152   : > { %p1209_p9 = pnand %p1208_p5, %p1202_p12 }
 0x224   : > { %v1038_v38 = vpop.f32.mrb[0].mxu1 }
 0x225   : > { %v653_v40 = vadd.f32 %v1038_v38, %v573_v37  ;;  %v647_v41 = vpop.f32.mrb[1].mxu1 }
 0x226   : > { %v648_v42 = vadd.f32 %v647_v41, %v568_v39 }
 0x227   : > { %v698_v43 = vsel %vm558_vm1, %v653_v40, inf }
 0x228   : > { %v697_v44 = vsel %vm558_vm1, %v648_v42, inf  ;;  %656 = vxpose.xlu0.b32.start [1/2] (short) (narrow) %v648_v42, 64 }
 0x229   : > { %v699_v45 = vmin.f32 %v697_v44, %v698_v43 }
 0x22b   : > { %v700_v46 = vrot.slane %v699_v45, 4 }
 0x22c   : > { %657 = vxpose.xlu0.b32.end [2/2] (short) (narrow) %v653_v40, 64 }
 0x22d   : > { %v701_v47 = vmin.f32 %v699_v45, %v700_v46 }
 0x22f   : > { %v702_v48 = vrot.slane %v701_v47, 2 }
 0x231   : > { %v703_v49 = vmin.f32 %v701_v47, %v702_v48 }
 0x233   : > { %v704_v50 = vrot.slane %v703_v49, 1 }
 0x235   : > { %v705_v51 = vmin.f32 %v703_v49, %v704_v50 }
 0x237   : > { %v706_v54 = vsub.f32 %v648_v42, %v705_v51  ;;  %v707_v55 = vsub.f32 %v653_v40, %v705_v51 }
 0x239   : > { %v710_v56 = vmul.f32 %v708_v52, %v706_v54  ;;  %v711_v57 = vmul.f32 %v709_v53, %v707_v55 }
 0x23b   : > { %v712_v58 = vsel %vm558_vm1, %v710_v56, -inf  ;;  %v713_v59 = vsel %vm558_vm1, %v711_v57, -inf }
 0x23c   : > { %v714_v60 = vmax.f32 %v712_v58, %v713_v59 }
 0x23e   : > { %v715_v61 = vrot.slane %v714_v60, 4 }
 0x240   : > { %v716_v63 = vmax.f32 %v714_v60, %v715_v61 }
 0x242   : > { %v717_v0 = vrot.slane %v716_v63, 2 }
 0x244   : > { %v718_v2 = vmax.f32 %v716_v63, %v717_v0 }
 0x246   : > { %v719_v3 = vrot.slane %v718_v2, 1 }
 0x247   : > { %1212 = shalt.err (!%p1209_p9)
}
 0x248   : > { %s1213_s12 = scalar_lea.hbm %s1612_s26, 512  ;;  %s1217_s17 = scalar_lea.hbm %s1712_s6, 1024 }
 0x249   : > { %p1214_p1 = scmp.ne.s32.totalorder %s1612_s26, %s1213_s12  ;;  %p1218_p7 = scmp.lt.u32.totalorder %s1612_s26, %s1712_s6 }
 0x24a   : > { %p1219_p13 = scmp.lt.u32.totalorder %s1217_s17, %s1213_s12  ;;  %p1221_p6 = scmp.lt.u32.totalorder %s1213_s12, %s1612_s26 }
 0x24b   : > { %p1215_p2 = pnand %p1214_p1, %p1472_p10 }
 0x24c   : > { %p1220_p4 = por %p1219_p13, %p1218_p7 }
 0x24d   : > { %p1216_p3 = pneg %p1215_p2 }
 0x24e   : > { %p1222_p8 = por %p1221_p6, %p1220_p4 }
 0x250   : > { %p1223_p12 = pnand %p1222_p8, %p1216_p3 }
 0x252   : > { %1226 = shalt.err (!%p1223_p12)
}
 0x253   : > { %s1325_s25 = smov 128   ;;  %s1326_s11 = smov 8   ;;  %v723_v4 = vadd.s32 8, %v722_v1  ;;  %v720_v5 = vmax.f32 %v718_v2, %v719_v3  ;;  %vm741_vm7 = vcmask 516096  }
 0x254   : > { %1061 = dma.vmem_to_hbm [thread:$0]  (%p1472_p10), %s1606_s16, 512, %s1612_s26, %s744_s18, %s1325_s25, %s1325_s25, %s1326_s11  }
 0x255   : > { %vm724_vm2 = vcmp.eq.f32.partialorder %v710_v56, %v720_v5  ;;  %vm725_vm3 = vcmp.eq.f32.partialorder %v711_v57, %v720_v5  ;;  %s993_s16 = sshll.u32 %s1309_s30, 4  ;;  %s403_s26 = scalar_lea.vmem [#allocation8], %s1531_s14 }
 0x256   : > { %v726_v6 = vsel %vm724_vm2, %v722_v1, 16  ;;  %v727_v7 = vsel %vm725_vm3, %v723_v4, 16  ;;  %s792_s18 = sshll.u32 %s403_s26, 4  ;;  %s1645_s3 = scalar_lea.hbm %s1714_s8, %s993_s16  ;;  %s1647_s18 = int_to_ptr.vmem [resolvable:$true] %s792_s18 }
 0x257   : > { %v728_v8 = vsel %vm558_vm1, %v726_v6, 2147483647  ;;  %v729_v9 = vsel %vm558_vm1, %v727_v7, 2147483647  ;;  %s758_s15 = scalar_lea.sflag [#allocation9], %s1531_s14  ;;  %s1227_s17 = scalar_lea.vmem %s1647_s18, 16 }
 0x258   : > { %vm730_vm4 = vcmp.lt.s32.totalorder %v728_v8, %v729_v9  ;;  %p1228_p11 = scmp.ne.s32.totalorder %s1647_s18, %s1227_s17  ;;  %s1327_s30 = smov [#allocation8]  }
 0x259   : > { %v731_v10 = vsel %vm730_vm4, %v728_v8, %v729_v9  ;;  %s1231_s13 = sshll.u32 %s1327_s30, 4  ;;  %s1232_s13 = int_to_ptr.vmem [resolvable:$false] %s1231_s13 }
 0x25a   : > { %v732_v11 = vrot.slane %v731_v10, 4  ;;  %p1229_p0 = pnand %p1228_p11, %p1472_p10  ;;  %s1233_s22 = scalar_lea.vmem %s1232_s13, 32 }
 0x25b   : > { %p1234_p9 = scmp.lt.s32.totalorder %s1647_s18, %s1232_s13  ;;  %p1235_p1 = scmp.lt.s32.totalorder %s1233_s22, %s1227_s17 }
 0x25c   : > { %vm733_vm5 = vcmp.lt.s32.totalorder %v731_v10, %v732_v11  ;;  %p1230_p5 = pneg %p1229_p0 }
 0x25d   : > { %v734_v12 = vsel %vm733_vm5, %v731_v10, %v732_v11  ;;  %p1236_p2 = por %p1235_p1, %p1234_p9 }
 0x25e   : > { %v735_v13 = vrot.slane %v734_v12, 2 }
 0x25f   : > { %p1237_p3 = pnand %p1236_p2, %p1230_p5 }
 0x260   : > { %vm736_vm6 = vcmp.lt.s32.totalorder %v734_v12, %v735_v13 }
 0x261   : > { %v737_v14 = vsel %vm736_vm6, %v734_v12, %v735_v13 }
 0x262   : > { %v738_v15 = vrot.slane %v737_v14, 1 }
 0x264   : > { %vm739_vm8 = vcmp.lt.s32.totalorder %v737_v14, %v738_v15 }
 0x265   : > { %v740_v16 = vsel %vm739_vm8, %v737_v14, %v738_v15 }
 0x266   : > { %742 = vst.msk [vmem:[%s403_s26] sm:$0x1] %vm741_vm7, %v740_v16 }
 0x267   : > { %1240 = shalt.err (!%p1237_p3)
}
 0x268   : > { %s1241_s14 = scalar_lea.hbm %s1645_s3, 16  ;;  %s1245_s16 = scalar_lea.hbm %s1714_s8, 32 }
 0x269   : > { %p1242_p7 = scmp.ne.s32.totalorder %s1645_s3, %s1241_s14  ;;  %p1246_p6 = scmp.lt.u32.totalorder %s1645_s3, %s1714_s8 }
 0x26a   : > { %p1247_p8 = scmp.lt.u32.totalorder %s1245_s16, %s1241_s14  ;;  %p1249_p11 = scmp.lt.u32.totalorder %s1241_s14, %s1645_s3 }
 0x26b   : > { %p1243_p13 = pnand %p1242_p7, %p1472_p10 }
 0x26c   : > { %p1248_p12 = por %p1247_p8, %p1246_p6 }
 0x26d   : > { %p1244_p4 = pneg %p1243_p13 }
 0x26e   : > { %p1250_p0 = por %p1249_p11, %p1248_p12 }
 0x270   : > { %p1251_p5 = pnand %p1250_p0, %p1244_p4 }
 0x272   : > { %1254 = shalt.err (!%p1251_p5)
}
 0x273   : > { %1062 = dma.vmem_to_hbm [thread:$0]  (%p1472_p10), %s1647_s18, 16, %s1645_s3, %s758_s15   ;;  %vm688_vm9 = vcmask 130048  }
 0x274   : > { %s998_s12 = sshll.u32 %s1597_s19, 6 }
 0x275   : > { %s420_s13 = scalar_lea.vmem %s1713_s7, %s998_s12 }
 0x2a8   : > { %v672_v17 = vpop.trf.xlu0 }
 0x2a9   : > { %689 = vst.msk [vmem:[%s420_s13] sm:$0xff] %vm688_vm9, %v672_v17 }
 0x2ac   : > { %v673_v18 = vpop.trf.xlu0 }
 0x2ad   : > { %690 = vst.msk [vmem:[%s420_s13 + $0x8] sm:$0xff] %vm688_vm9, %v673_v18 }
 0x2b0   : > { %v674_v19 = vpop.trf.xlu0 }
 0x2b1   : > { %691 = vst.msk [vmem:[%s420_s13 + $0x10] sm:$0xff] %vm688_vm9, %v674_v19 }
 0x2b4   : > { %v675_v20 = vpop.trf.xlu0 }
 0x2b5   : > { %692 = vst.msk [vmem:[%s420_s13 + $0x18] sm:$0xff] %vm688_vm9, %v675_v20 }
 0x2b8   : > { %v676_v21 = vpop.trf.xlu0 }
 0x2b9   : > { %693 = vst.msk [vmem:[%s420_s13 + $0x20] sm:$0xff] %vm688_vm9, %v676_v21 }
 0x2bc   : > { %v677_v22 = vpop.trf.xlu0 }
 0x2bd   : > { %694 = vst.msk [vmem:[%s420_s13 + $0x28] sm:$0xff] %vm688_vm9, %v677_v22 }
 0x2c0   : > { %v678_v23 = vpop.trf.xlu0 }
 0x2c1   : > { %695 = vst.msk [vmem:[%s420_s13 + $0x30] sm:$0xff] %vm688_vm9, %v678_v23 }
 0x2c4   : > { %v679_v24 = vpop.trf.xlu0 }
 0x2c5   : > { %696 = vst.msk [vmem:[%s420_s13 + $0x38] sm:$0xff] %vm688_vm9, %v679_v24 }
 0x2c6 PF: > { %s1740_s20 = sld [smem:[#allocation14_spill]]  ;;  %s804_s19 = sand.u32 1, %s1297_s27  }
 0x2c7   : > { %p1742_p9 = scmp.ge.s32.totalorder %s1317_s10, 2  ;;  %s805_s18 = scalar_lea.sflag [#allocation4], %s804_s19 }
 0x2cc   : > { %p1741_p10 = scmp.ne.s32.totalorder %s1740_s20, 0 }
 0x2ce   : > { %p1074_p1 = pnand %p1742_p9, %p1741_p10 }
 0x2d0   : > { %1288 = dma.done.wait (!%p1074_p1), %s805_s18, 512  }
 0x2d1   : > { %1290 = vsyncadd (!%p1074_p1), %s805_s18, 4294966784  ;;  %s826_s3 = scalar_lea.sflag [#allocation9], %s804_s19 }
 0x2d2   : > { %1292 = dma.done.wait (!%p1074_p1), %s826_s3, 16  }
 0x2d3   : > { %1294 = vsyncadd (!%p1074_p1), %s826_s3, 4294967280  ;;  %s29_s10 = sadd.s32 1, %s1317_s10   ;;  %s1743_s27 = smov %s1301_s28 }
 0x2d4   : > { %p26_p2 = scmp.ge.s32.totalorder %s29_s10, 4   ;;  %s1744_s28 = smov %s1305_s29 }
 0x2d5   : > { %s1745_s29 = smov %s1481_s24  ;;  %s1746_s30 = smov %s1313_s9 }
 0x2d6   : > { %s1747_s9 = smov %s1749_s21  ;;  %28 = sbr.rel (!%p26_p2) target bundleno = 11 (0xb), region = 125 }
 0x2dd   :  { %830 = vsyncpa [#allocation3], 1 }
 0x2de   :  { %832 = vsyncpa [#allocation3 + $0x1], 1 }
 0x2df   :  { %833 = vsyncpa [#allocation6], 1 }
 0x2e0   :  { %834 = vsyncpa [#allocation4], 1 }
 0x2e1   :  { %836 = vsyncpa [#allocation4 + $0x1], 1 }
 0x2e2   :  { %837 = vsyncpa [#allocation9], 1 }
 0x2e3   :  { %839 = vsyncpa [#allocation9 + $0x1], 1 }

</bundles_post_ra>
